<compile_context>
chip_gen: v5e
topology: v5e:2x2
jax: 0.10.0
libtpu: 0.0.40
codegen_flags: <defaults>
</compile_context>

<pallas_src>
import functools

import jax
import jax.numpy as jnp
from jax.experimental import pallas as pl
from jax.experimental.pallas import tpu as pltpu


def _round_up(x, m):
  return (x + m - 1) // m * m


def _cdiv(a, b):
  return (a + b - 1) // b


def _pooling_net_kernel(xcat_ref, batch_ref, w1_ref, w2_ref, b2_ref,
                        out_ref, acc_ref, *, num_graphs):
  """One node tile: transposed MLP (node-on-lanes) + running per-graph max.

  xcat_ref : (Kp, TN) bf16  [x; pos; 1]^T  (ones row folds b1 into W1)
  batch_ref: (1,  TN) i32   graph id per node (padding columns carry id == G)
  w1_ref   : (H1, Kp) bf16  (W1 | b1)^T
  w2_ref   : (H2, H1) bf16  W2^T
  b2_ref   : (H2, 1)  f32
  out_ref  : (H2, G)  f32   pooled max for this core-split (leading dim squeezed)
  acc_ref  : (H2, G)  f32   VMEM running-max accumulator
  """
  step = pl.program_id(1)

  @pl.when(step == 0)
  def _init():
    acc_ref[...] = jnp.full(acc_ref.shape, -jnp.inf, dtype=acc_ref.dtype)

  # ---- MLP hot path: bf16 MXU matmuls in (feature, node) orientation ----
  # Layer-1 bias is folded into w1 via the ones row of xcat -> no VPU add.
  h = jnp.dot(w1_ref[...], xcat_ref[...], preferred_element_type=jnp.float32)
  h = jnp.maximum(h, 0.0)                                      # (H1, TN) f32
  h = jnp.dot(w2_ref[...], h.astype(w2_ref.dtype),
              preferred_element_type=jnp.float32)
  h = jnp.maximum(h + b2_ref[...], 0.0)                        # (H2, TN) f32

  # ---- per-tile segment max over the lane (node) axis ----
  batch_row = batch_ref[...]                                   # (1, TN) i32
  tn = batch_row.shape[1]
  gids = jax.lax.broadcasted_iota(jnp.int32, (num_graphs, tn), 0)
  mask = gids == batch_row                                     # (G, TN), built once
  neg_inf = jnp.float32(-jnp.inf)
  cols = []
  # num_graphs is a small static Python int here; for very large graph counts
  # a scalar-prefetch sorted-segment reduction would replace this unrolled loop.
  for g in range(num_graphs):
    seg = jnp.max(jnp.where(mask[g:g + 1, :], h, neg_inf),
                  axis=1, keepdims=True)                       # (H2, 1)
    cols.append(seg)
  tile_max = jnp.concatenate(cols, axis=1)                     # (H2, G)
  acc_ref[...] = jnp.maximum(acc_ref[...], tile_max)

  @pl.when(step == pl.num_programs(1) - 1)
  def _flush():
    out_ref[...] = acc_ref[...]                                # single final store


def pooling_net_forward(x, pos, batch, params, *, num_graphs,
                        tile_nodes=8192, core_split=2):
  """JAX wrapper reproducing PoolingNet.forward.

  Returns (pooled, pos_out, batch_out) exactly like the PyTorch module.
  Graphs with no nodes pool to -inf (jax.ops.segment_max convention).
  """
  w1, b1, w2, b2 = params
  n, f = x.shape
  p = pos.shape[1]
  k_in = f + p
  h1 = w1.shape[1]
  h2 = w2.shape[1]
  k_pad = _round_up(k_in + 1, 8)            # +1 ones row folds b1 into W1

  core_split = max(1, int(core_split))      # 2 -> uses both v7x TensorCores
  tile_nodes = max(128, _round_up(int(tile_nodes), 128))
  tn = min(tile_nodes, _round_up(max(1, _cdiv(n, core_split)), 128))
  tiles_per_split = max(1, _cdiv(n, core_split * tn))
  n_pad = core_split * tiles_per_split * tn

  # [x | pos | 1] in (feature, node) orientation, bf16 for the MXU.  The node
  # axis lives on the 128-wide lane dim so all VPU/pooling ops are lane-dense.
  ones = jnp.ones((n, 1), jnp.float32)
  xcat = jnp.concatenate(
      [x.astype(jnp.float32), pos.astype(jnp.float32), ones], axis=1)
  xcat_t = jnp.pad(xcat.astype(jnp.bfloat16).T,
                   ((0, k_pad - (k_in + 1)), (0, n_pad - n)))

  # Lane-dense (1, N) graph ids; padding columns get id == num_graphs so they
  # never match any graph.
  batch_row = jnp.pad(batch.astype(jnp.int32).reshape(1, -1),
                      ((0, 0), (0, n_pad - n)), constant_values=num_graphs)

  # (W1 | b1)^T with the contraction padded to k_pad; W2^T; b2 column.
  w1_aug = jnp.zeros((k_pad, h1), jnp.float32)
  w1_aug = w1_aug.at[:k_in].set(w1.astype(jnp.float32))
  w1_aug = w1_aug.at[k_in].set(b1.astype(jnp.float32))
  w1t = w1_aug.T.astype(jnp.bfloat16)               # (H1, Kp)
  w2t = w2.T.astype(jnp.bfloat16)                   # (H2, H1)
  b2c = b2.reshape(-1, 1).astype(jnp.float32)       # (H2, 1)

  node_idx = lambda c, i: (0, c * tiles_per_split + i)
  const_idx = lambda c, i: (0, 0)

  flops = 2 * n_pad * k_pad * h1 + 2 * n_pad * h1 * h2
  bytes_accessed = (xcat_t.size * 2 + batch_row.size * 4 + w1t.size * 2 +
                    w2t.size * 2 + b2c.size * 4 +
                    core_split * h2 * num_graphs * 4)

  kernel = functools.partial(_pooling_net_kernel, num_graphs=num_graphs)

  partial_max = pl.pallas_call(
      kernel,
      out_shape=jax.ShapeDtypeStruct((core_split, h2, num_graphs), jnp.float32),
      grid_spec=pltpu.PrefetchScalarGridSpec(
          num_scalar_prefetch=0,
          grid=(core_split, tiles_per_split),
          in_specs=[
              pl.BlockSpec((k_pad, tn), node_idx),    # xcat^T node tile
              pl.BlockSpec((1, tn), node_idx),        # graph ids (lane-dense)
              pl.BlockSpec((h1, k_pad), const_idx),   # (W1|b1)^T, resident
              pl.BlockSpec((h2, h1), const_idx),      # W2^T, resident
              pl.BlockSpec((h2, 1), const_idx),       # b2
          ],
          out_specs=pl.BlockSpec((None, h2, num_graphs),
                                 lambda c, i: (c, 0, 0)),
          scratch_shapes=[pltpu.VMEM((h2, num_graphs), jnp.float32)],
      ),
      compiler_params=pltpu.CompilerParams(
          dimension_semantics=("parallel", "arbitrary"),  # cores x node tiles
          vmem_limit_bytes=32 * 1024 * 1024,              # safe on v5e/v6e/v7x
      ),
      cost_estimate=pl.CostEstimate(
          flops=flops, transcendentals=0, bytes_accessed=bytes_accessed),
  )(xcat_t, batch_row, w1t, w2t, b2c)

  # Combine the per-core-split partial maxima and transpose the tiny (H2, G).
  pooled = jnp.max(partial_max, axis=0).T                      # (G, H2)
  pos_out = jnp.zeros((num_graphs, 3), dtype=pos.dtype)
  batch_out = jnp.arange(num_graphs, dtype=jnp.int32)
  return pooled, pos_out, batch_out


def init_params(key, in_dim, h1, h2):
  """Deterministic synthetic parameters for `self.net` (Linear-ReLU-Linear-ReLU).

  Weights stored (in, out) so the math is x @ W + b.
  """
  k1, k2, k3, k4 = jax.random.split(key, 4)
  w1 = jax.random.normal(k1, (in_dim, h1), jnp.float32) * 0.1
  b1 = jax.random.normal(k2, (h1,), jnp.float32) * 0.1
  w2 = jax.random.normal(k3, (h1, h2), jnp.float32) * 0.1
  b2 = jax.random.normal(k4, (h2,), jnp.float32) * 0.1
  return (w1, b1, w2, b2)


def _reference_forward(x, pos, batch, params, num_graphs):
  """Pure-JAX f32 reference for correctness checking."""
  w1, b1, w2, b2 = params
  h = jnp.concatenate([x, pos], axis=1)
  h = jnp.maximum(h @ w1 + b1, 0.0)
  h = jnp.maximum(h @ w2 + b2, 0.0)
  return jax.ops.segment_max(h, batch, num_segments=num_graphs)


if __name__ == "__main__":
  key = jax.random.PRNGKey(0)
  kx, kp, kparams, kx2, kp2 = jax.random.split(key, 5)

  # --- check 1: tiny shapes consistent with the module ---
  N, F = 16, 4
  H1, H2 = 32, 32
  NUM_GRAPHS = 2

  x = jax.random.normal(kx, (N, F), jnp.float32)
  pos = jax.random.normal(kp, (N, 3), jnp.float32)
  batch = jnp.concatenate([
      jnp.zeros((N // 2,), jnp.int32),
      jnp.ones((N - N // 2,), jnp.int32),
  ])
  params = init_params(kparams, F + 3, H1, H2)

  fwd = jax.jit(functools.partial(pooling_net_forward, num_graphs=NUM_GRAPHS))
  pooled, pos_out, batch_out = fwd(x, pos, batch, params)
  jax.block_until_ready((pooled, pos_out, batch_out))

  ref = _reference_forward(x, pos, batch, params, NUM_GRAPHS)
  assert pooled.shape == (NUM_GRAPHS, H2)
  assert pos_out.shape == (NUM_GRAPHS, 3)
  assert batch_out.shape == (NUM_GRAPHS,)
  assert jnp.allclose(pooled, ref, atol=2e-2, rtol=2e-2), (
      jnp.max(jnp.abs(pooled - ref)))
  assert jnp.all(pos_out == 0)
  assert jnp.all(batch_out == jnp.arange(NUM_GRAPHS))

  # --- check 2: multiple node tiles per core-split, unsorted batch ids ---
  N2, G2 = 300, 3
  x2 = jax.random.normal(kx2, (N2, F), jnp.float32)
  pos2 = jax.random.normal(kp2, (N2, 3), jnp.float32)
  batch2 = jnp.arange(N2, dtype=jnp.int32) % G2

  fwd2 = jax.jit(functools.partial(pooling_net_forward, num_graphs=G2,
                                   tile_nodes=128, core_split=2))
  pooled2, _, _ = fwd2(x2, pos2, batch2, params)
  jax.block_until_ready(pooled2)
  ref2 = _reference_forward(x2, pos2, batch2, params, G2)
  assert jnp.allclose(pooled2, ref2, atol=2e-2, rtol=2e-2), (
      jnp.max(jnp.abs(pooled2 - ref2)))

  print("KERNEL_OK")
</pallas_src>

<mosaic_0001>
module attributes {stable_mosaic.version = 11 : i64} {
  func.func @_pooling_net_kernel(%arg0: i32, %arg1: i32, %arg2: memref<8x128xbf16, #tpu.memory_space<vmem>>, %arg3: memref<1x128xi32, #tpu.memory_space<vmem>>, %arg4: memref<32x8xbf16, #tpu.memory_space<vmem>>, %arg5: memref<32x32xbf16, #tpu.memory_space<vmem>>, %arg6: memref<32x1xf32, #tpu.memory_space<vmem>>, %arg7: memref<1x32x2xf32, #tpu.memory_space<vmem>>, %arg8: memref<32x2xf32, #tpu.memory_space<vmem>>) attributes {dimension_semantics = [#tpu.dimension_semantics<parallel>, #tpu.dimension_semantics<arbitrary>], iteration_bounds = array<i64: 2, 1>, scalar_prefetch = 0 : i64, scratch_operands = 1 : i64, tpu.core_type = #tpu.core_type<tc>, window_params = [{transform_indices = @transform_0, window_bounds = array<i64: 8, 128>}, {transform_indices = @transform_1, window_bounds = array<i64: 1, 128>}, {pipeline_mode = #tpu.pipeline_mode<synchronous>, transform_indices = @transform_2, window_bounds = array<i64: 32, 8>}, {pipeline_mode = #tpu.pipeline_mode<synchronous>, transform_indices = @transform_3, window_bounds = array<i64: 32, 32>}, {pipeline_mode = #tpu.pipeline_mode<synchronous>, transform_indices = @transform_4, window_bounds = array<i64: 32, 1>}, {transform_indices = @transform_5, window_bounds = array<i64: 1, 32, 2>}]} {
    %c0_i32 = arith.constant 0 : i32
    %0 = arith.cmpi eq, %arg1, %c0_i32 : i32
    %1 = arith.extui %0 : i1 to i32
    %c0_i32_0 = arith.constant 0 : i32
    %2 = arith.cmpi ne, %1, %c0_i32_0 : i32
    scf.if %2 {
      %cst_23 = arith.constant 0xFF800000 : f32
      %41 = vector.broadcast %cst_23 : f32 to vector<32x2xf32>
      %c0_24 = arith.constant 0 : index
      %c0_25 = arith.constant 0 : index
      %42 = vector.load %arg8[%c0_24, %c0_25] : memref<32x2xf32, #tpu.memory_space<vmem>>, vector<32x2xf32>
      tpu.vector_store %arg8[%c0_24, %c0_25], %41 {strides = array<i32>} : memref<32x2xf32, #tpu.memory_space<vmem>>, vector<32x2xf32>,
    } else {
    }
    %c0 = arith.constant 0 : index
    %c0_1 = arith.constant 0 : index
    %3 = vector.load %arg4[%c0, %c0_1] : memref<32x8xbf16, #tpu.memory_space<vmem>>, vector<32x8xbf16>
    %c0_2 = arith.constant 0 : index
    %c0_3 = arith.constant 0 : index
    %4 = vector.load %arg2[%c0_2, %c0_3] : memref<8x128xbf16, #tpu.memory_space<vmem>>, vector<8x128xbf16>
    %cst = arith.constant dense<0.000000e+00> : vector<32x128xf32>
    %5 = tpu.matmul %3, %4, %cst {dimension_numbers = #tpu.dot_dimension_numbers<[1], [0], [0], [1], [0, 0, 1, 1], [], []>} : vector<32x8xbf16>, vector<8x128xbf16>, vector<32x128xf32> -> vector<32x128xf32>
    %cst_4 = arith.constant 0.000000e+00 : f32
    %6 = vector.broadcast %cst_4 : f32 to vector<32x128xf32>
    %7 = arith.maximumf %5, %6 : vector<32x128xf32>
    %c0_5 = arith.constant 0 : index
    %c0_6 = arith.constant 0 : index
    %8 = vector.load %arg5[%c0_5, %c0_6] : memref<32x32xbf16, #tpu.memory_space<vmem>>, vector<32x32xbf16>
    %9 = arith.truncf %7 : vector<32x128xf32> to vector<32x128xbf16>
    %cst_7 = arith.constant dense<0.000000e+00> : vector<32x128xf32>
    %10 = tpu.matmul %8, %9, %cst_7 {dimension_numbers = #tpu.dot_dimension_numbers<[1], [0], [0], [1], [0, 0, 1, 1], [], []>} : vector<32x32xbf16>, vector<32x128xbf16>, vector<32x128xf32> -> vector<32x128xf32>
    %c0_8 = arith.constant 0 : index
    %c0_9 = arith.constant 0 : index
    %11 = vector.load %arg6[%c0_8, %c0_9] : memref<32x1xf32, #tpu.memory_space<vmem>>, vector<32x1xf32>
    %12 = vector.broadcast %11 : vector<32x1xf32> to vector<32x128xf32>
    %13 = arith.addf %10, %12 : vector<32x128xf32>
    %cst_10 = arith.constant 0.000000e+00 : f32
    %14 = vector.broadcast %cst_10 : f32 to vector<32x128xf32>
    %15 = arith.maximumf %13, %14 : vector<32x128xf32>
    %c0_11 = arith.constant 0 : index
    %c0_12 = arith.constant 0 : index
    %16 = vector.load %arg3[%c0_11, %c0_12] : memref<1x128xi32, #tpu.memory_space<vmem>>, vector<1x128xi32>
    %17 = tpu.iota {dimensions = array<i32: 0>} : vector<2x128xi32>
    %18 = vector.broadcast %16 : vector<1x128xi32> to vector<2x128xi32>
    %19 = arith.cmpi eq, %17, %18 : vector<2x128xi32>
    %20 = vector.extract_strided_slice %19 {offsets = [0, 0], sizes = [1, 128], strides = [1, 1]} : vector<2x128xi1> to vector<1x128xi1>
    %cst_13 = arith.constant 0xFF800000 : f32
    %21 = vector.shape_cast %20 : vector<1x128xi1> to vector<1x128xi1>
    %22 = vector.broadcast %21 : vector<1x128xi1> to vector<32x128xi1>
    %23 = vector.broadcast %cst_13 : f32 to vector<32x128xf32>
    %24 = arith.select %22, %15, %23 : vector<32x128xi1>, vector<32x128xf32>
    %cst_14 = arith.constant dense<0xFF800000> : vector<32xf32>
    %25 = vector.multi_reduction <maximumf>, %24, %cst_14 [1] : vector<32x128xf32> to vector<32xf32>
    %26 = vector.shape_cast %25 : vector<32xf32> to vector<32x1xf32>
    %27 = vector.extract_strided_slice %19 {offsets = [1, 0], sizes = [1, 128], strides = [1, 1]} : vector<2x128xi1> to vector<1x128xi1>
    %cst_15 = arith.constant 0xFF800000 : f32
    %28 = vector.shape_cast %27 : vector<1x128xi1> to vector<1x128xi1>
    %29 = vector.broadcast %28 : vector<1x128xi1> to vector<32x128xi1>
    %30 = vector.broadcast %cst_15 : f32 to vector<32x128xf32>
    %31 = arith.select %29, %15, %30 : vector<32x128xi1>, vector<32x128xf32>
    %cst_16 = arith.constant dense<0xFF800000> : vector<32xf32>
    %32 = vector.multi_reduction <maximumf>, %31, %cst_16 [1] : vector<32x128xf32> to vector<32xf32>
    %33 = vector.shape_cast %32 : vector<32xf32> to vector<32x1xf32>
    %34 = tpu.concatenate %26, %33 in 1 : vector<32x1xf32>, vector<32x1xf32> -> vector<32x2xf32>
    %c0_17 = arith.constant 0 : index
    %c0_18 = arith.constant 0 : index
    %35 = vector.load %arg8[%c0_17, %c0_18] : memref<32x2xf32, #tpu.memory_space<vmem>>, vector<32x2xf32>
    %36 = arith.maximumf %35, %34 : vector<32x2xf32>
    %c0_19 = arith.constant 0 : index
    %c0_20 = arith.constant 0 : index
    %37 = vector.load %arg8[%c0_19, %c0_20] : memref<32x2xf32, #tpu.memory_space<vmem>>, vector<32x2xf32>
    tpu.vector_store %arg8[%c0_19, %c0_20], %36 {strides = array<i32>} : memref<32x2xf32, #tpu.memory_space<vmem>>, vector<32x2xf32>,
    %c0_i32_21 = arith.constant 0 : i32
    %38 = arith.cmpi eq, %arg1, %c0_i32_21 : i32
    %39 = arith.extui %38 : i1 to i32
    %c0_i32_22 = arith.constant 0 : i32
    %40 = arith.cmpi ne, %39, %c0_i32_22 : i32
    scf.if %40 {
      %c0_23 = arith.constant 0 : index
      %c0_24 = arith.constant 0 : index
      %41 = vector.load %arg8[%c0_23, %c0_24] : memref<32x2xf32, #tpu.memory_space<vmem>>, vector<32x2xf32>
      %c0_25 = arith.constant 0 : index
      %c0_26 = arith.constant 0 : index
      %c0_27 = arith.constant 0 : index
      %42 = vector.load %arg7[%c0_25, %c0_26, %c0_27] : memref<1x32x2xf32, #tpu.memory_space<vmem>>, vector<1x32x2xf32>
      %43 = vector.shape_cast %42 : vector<1x32x2xf32> to vector<32x2xf32>
      %44 = vector.shape_cast %41 : vector<32x2xf32> to vector<1x32x2xf32>
      tpu.vector_store %arg7[%c0_25, %c0_26, %c0_27], %44 {strides = array<i32>} : memref<1x32x2xf32, #tpu.memory_space<vmem>>, vector<1x32x2xf32>,
    } else {
    }
    return
  }
  func.func @transform_0(%arg0: i32, %arg1: i32) -> (i32, i32) {
    %c1_i32 = arith.constant 1 : i32
    %0 = arith.muli %arg0, %c1_i32 : i32
    %1 = arith.addi %0, %arg1 : i32
    %c0_i32 = arith.constant 0 : i32
    %c0_i32_0 = arith.constant 0 : i32
    return %c0_i32, %1 : i32, i32
  }
  func.func @transform_1(%arg0: i32, %arg1: i32) -> (i32, i32) {
    %c1_i32 = arith.constant 1 : i32
    %0 = arith.muli %arg0, %c1_i32 : i32
    %1 = arith.addi %0, %arg1 : i32
    %c0_i32 = arith.constant 0 : i32
    %c0_i32_0 = arith.constant 0 : i32
    return %c0_i32, %1 : i32, i32
  }
  func.func @transform_2(%arg0: i32, %arg1: i32) -> (i32, i32) {
    %c0_i32 = arith.constant 0 : i32
    %c0_i32_0 = arith.constant 0 : i32
    %c0_i32_1 = arith.constant 0 : i32
    return %c0_i32, %c0_i32_0 : i32, i32
  }
  func.func @transform_3(%arg0: i32, %arg1: i32) -> (i32, i32) {
    %c0_i32 = arith.constant 0 : i32
    %c0_i32_0 = arith.constant 0 : i32
    %c0_i32_1 = arith.constant 0 : i32
    return %c0_i32, %c0_i32_0 : i32, i32
  }
  func.func @transform_4(%arg0: i32, %arg1: i32) -> (i32, i32) {
    %c0_i32 = arith.constant 0 : i32
    %c0_i32_0 = arith.constant 0 : i32
    %c0_i32_1 = arith.constant 0 : i32
    return %c0_i32, %c0_i32_0 : i32, i32
  }
  func.func @transform_5(%arg0: i32, %arg1: i32) -> (i32, i32, i32) {
    %c0_i32 = arith.constant 0 : i32
    %c0_i32_0 = arith.constant 0 : i32
    %c0_i32_1 = arith.constant 0 : i32
    return %arg0, %c0_i32, %c0_i32_0 : i32, i32, i32
  }
}

</mosaic_0001>

<bundles_post_ra>
// kernel: pooling_net_forward.1
= control target key start
LH: loop header
LB: loop body
LE: loop exit
PB: predicated region body
PF: predicated region fallthrough
CT: control target
= control target key end

     0   :  { %s918_s18 = smov 0   ;;  %s920_s19 = smov 0   ;;  %s1265_s0 = inlined_call_operand.vmem [shape: bf16[8,256], index: 0, kind: input, shape index: {}]   ;;  %s1266_s1 = inlined_call_operand.vmem [shape: s32[1,256], index: 1, kind: input, shape index: {}]   ;;  %s1267_s2 = inlined_call_operand.vmem [shape: bf16[32,8], index: 2, kind: input, shape index: {}]   ;;  %s1268_s3 = inlined_call_operand.vmem [shape: bf16[32,32], index: 3, kind: input, shape index: {}]   ;;  %s1269_s4 = inlined_call_operand.vmem [shape: f32[32,1], index: 4, kind: input, shape index: {}]   ;;  %s1270_s5 = inlined_call_operand.vmem [shape: f32[2,32,2], index: 5, kind: output, shape index: {}]  }
   0x1   :  { %s922_s20 = smov 0  }
   0x2 LB: > { %s27_s21 = sadd.s32 1, %s880_s19  ;;  %p799_p0 = scmp.ge.s32.totalorder %s884_s20, 1  ;;  %s884_s20 = sphi %s922_s20, %s15_s20   ;;  %s880_s19 = sphi %s920_s19, %s1274_s19   ;;  %s876_s18 = sphi %s918_s18, %s1273_s18  }
   0x3   : > { %p29_p1 = scmp.ge.s32.totalorder %s27_s21, 2  ;;  %p214_p2 = scmp.lt.s32.totalorder %s884_s20, 3 }
   0x5   : > { %s1276_s21 = smov (%p29_p1, %s27_s21), 0  ;;  %p215_p3 = pnand %p799_p0, %p214_p2 }
   0x6   : > { %p247_p4 = scmp.lt.s32.totalorder (!%p215_p3), %s876_s18, 1 }
   0x7   : > { %218 = sbr.rel (%p215_p3) target bundleno = 497 (0x1f1), region = 40 }
   0xc   : > { %s1278_s18 = smov (!%p247_p4, %s876_s18), 1  ;;  %vm294_vm0 = vcmask 1043456   ;;  %v827_v2 = vld [vmem:[%s1267_s2 + $0x8] sm:$0xff]  ;;  %v826_v3 = vld [vmem:[%s1267_s2] sm:$0xff]  ;;  %vm287_vm1 = vcmask 64512   ;;  %v329_v5 = vld [vmem:[%s1269_s4 + $0x10] sm:$0xff]  ;;  %v392_v21 = vlaneseq }
   0xd   : > { %s800_s22 = sshll.u32 %s1278_s18, 2  ;;  %s255_s25 = scalar_lea.vmem %s1266_s1, %s1278_s18  ;;  %v327_v4 = vld [vmem:[%s1269_s4] sm:$0xff]  ;;  %v886_v6 = vmov 0   ;;  %v328_v7 = vld [vmem:[%s1269_s4 + $0x8] sm:$0xff]  ;;  %v330_v8 = vld [vmem:[%s1269_s4 + $0x18] sm:$0xff]  ;;  %vm361_vm2 = vcmask 261120  }
   0xe   : > { %s250_s28 = scalar_lea.vmem %s1265_s0, %s800_s22  ;;  %859 = vset.pattern.permute.xlu0 %v886_v6  ;;  %860 = vset.pattern.permute.xlu1 %v886_v6  ;;  %v828_v19 = vld [vmem:[%s1268_s3] sm:$0xff]  ;;  %v829_v20 = vld [vmem:[%s1268_s3 + $0x8] sm:$0xff]  ;;  %v393_v23 = vshrl.u32 %v392_v21, 7  ;;  %vm530_vm4 = vcmask 1042434   ;;  %vm533_vm5 = vcmask 1043459   ;;  %vm536_vm6 = vcmask 1044484  }
   0xf   : > { %v276_v0 = vld [vmem:[%s250_s28] sm:$0xf]  ;;  %333 = vperm.xlu0 %859, %v327_v4   ;;  %343 = vperm.xlu1 %860, %v329_v5   ;;  %vm539_vm7 = vcmask 1045509   ;;  %vm542_vm8 = vcmask 1046534   ;;  %vm545_vm9 = vcmask 1047559   ;;  %vm661_vm10 = vcmask 1047553  }
  0x10   : > { %v296_v1 = vsel %vm294_vm0, %v276_v0, 0  ;;  %v861_v24 = vld [vmem:[%s255_s25] ss:$0 sm:$0xff]  ;;  %vm527_vm11 = vcmask 1041409   ;;  %vm671_vm12 = vcmask 1040384   ;;  %vm267_vm13 = vcmask 15360  }
  0x11   : > { %830 = vmatpush.bf16.msra.mxu3 %v296_v1  ;;  %305 = vmatpush.bf16.msra.mxu0 %v296_v1  ;;  %vm975_vm3 = vcmp.eq.s32.totalorder %v393_v23, %v861_v24  ;;  %vm680_vm14 = vcmask 1046528   ;;  %vm694_vm15 = vcmask 7168   ;;  %s825_s25 = sshll.u32 %s1278_s18, 5 }
  0x12   : > { %s261_s29 = scalar_lea.vmem %s1270_s5, %s825_s25 }
  0x14   : > { %812 = vmatmul.msk.bf16.vlgmr.msra.gmra.mxu3 %vm287_vm1, %v827_v2  ;;  %811 = vmatmul.msk.bf16.vlgmr.msra.gmra.mxu0 %vm287_vm1, %v826_v3 }
  0x17   : > { %338 = vperm.xlu0 %859, %v328_v7   ;;  %348 = vperm.xlu1 %860, %v330_v8  }
  0x81   : > { %v334_v22 = vpop.permute.xlu0 %333  ;;  %v344_v40 = vpop.permute.xlu1 %343 }
  0x89   : > { %v339_v37 = vpop.permute.xlu0 %338 }
  0x91   : > { %v307_v9 = vpop.f32.mrf.mxu0 }
  0x92   : > { %v317_v15 = vmax.f32 %v307_v9, 0.0 }
  0x97   : > { %v312_v10 = vpop.f32.mrf.mxu3 }
  0x98   : > { %v319_v13 = vmax.f32 %v312_v10, 0.0 }
  0x99   : > { %v309_v11 = vpop.f32.mrf.mxu0 }
  0x9a   : > { %v318_v16 = vmax.f32 %v309_v11, 0.0  ;;  %v349_v11 = vpop.permute.xlu1 %348 }
  0x9c   : > { %v325_v18 = vpack.c.bf16 %v318_v16, %v317_v15 }
  0x9f   : > { %v314_v12 = vpop.f32.mrf.mxu3 }
  0xa0   : > { %v320_v14 = vmax.f32 %v314_v12, 0.0 }
  0xa2   : > { %v326_v17 = vpack.c.bf16 %v320_v14, %v319_v13 }
  0xa4   : > { %374 = vmatpush.bf16.msra.mxu1 %v326_v17  ;;  %831 = vmatpush.bf16.msra.mxu2 %v326_v17 }
  0xa8   : > { %375 = vmatpush.bf16.msra.mxu1 %v325_v18  ;;  %832 = vmatpush.bf16.msra.mxu2 %v325_v18 }
  0xab   : > { %821 = vmatmul.msk.bf16.vlgmr.msra.gmra.mxu1 %vm361_vm2, %v828_v19  ;;  %822 = vmatmul.msk.bf16.vlgmr.msra.gmra.mxu2 %vm361_vm2, %v829_v20 }
 0x128   : > { %v377_v25 = vpop.f32.mrf.mxu1 }
 0x129   : > { %v378_v26 = vadd.f32 %v377_v25, %v334_v22 }
 0x12b   : > { %v387_v27 = vmax.f32 %v378_v26, 0.0 }
 0x12d   : > { %v402_v29 = vrot.slane %v387_v27, 1  ;;  %v403_v30 = vrot.slane %v387_v27, 2  ;;  %v404_v31 = vrot.slane %v387_v27, 3  ;;  %v408_v32 = vrot.slane %v387_v27, 7 }
 0x12e   : > { %v405_v33 = vrot.slane %v387_v27, 4  ;;  %v981_v34 = vsel %vm975_vm3, %v387_v27, -inf  ;;  %v406_v39 = vrot.slane %v387_v27, 5  ;;  %v382_v41 = vpop.f32.mrf.mxu2  ;;  %v407_v53 = vrot.slane %v387_v27, 6 }
 0x12f   : > { %v985_v35 = vsel %vm975_vm3, %v402_v29, -inf  ;;  %v989_v36 = vsel %vm975_vm3, %v403_v30, -inf  ;;  %v993_v43 = vsel %vm975_vm3, %v408_v32, -inf  ;;  %v997_v44 = vsel %vm975_vm3, %v404_v31, -inf }
 0x130   : > { %v379_v38 = vpop.f32.mrf.mxu1  ;;  %v601_v45 = vrot.slane %v981_v34, 7  ;;  %v603_v46 = vrot.slane %v985_v35, 6  ;;  %v605_v47 = vrot.slane %v989_v36, 5  ;;  %v1004_v49 = vsel %vm975_vm3, %v405_v33, -inf }
 0x131   : > { %v380_v42 = vadd.f32 %v379_v38, %v339_v37  ;;  %v383_v50 = vadd.f32 %v382_v41, %v344_v40  ;;  %v1008_v51 = vsel %vm975_vm3, %v406_v39, -inf  ;;  %v607_v55 = vrot.slane %v997_v44, 4 }
 0x132   : > { %v602_v52 = vsel %vm530_vm4, %v601_v45, %v993_v43  ;;  %v609_v59 = vrot.slane %v1004_v49, 3  ;;  %v611_v62 = vrot.slane %v1008_v51, 2  ;;  %v1023_v2 = vsel %vm975_vm3, %v407_v53, -inf }
 0x133   : > { %v388_v48 = vmax.f32 %v380_v42, 0.0  ;;  %v604_v54 = vsel %vm533_vm5, %v603_v46, %v602_v52  ;;  %v1018_v0 = vmax.f32 %v383_v50, 0.0  ;;  %v613_v14 = vrot.slane %v1023_v2, 1 }
 0x134   : > { %v606_v58 = vsel %vm536_vm6, %v605_v47, %v604_v54  ;;  %v538_v28 = vrot.slane %v1008_v51, 3 }
 0x135   : > { %v409_v56 = vrot.slane %v388_v48, 1  ;;  %v410_v57 = vrot.slane %v388_v48, 2  ;;  %v415_v60 = vrot.slane %v388_v48, 7  ;;  %v608_v61 = vsel %vm539_vm7, %v607_v55, %v606_v58 }
 0x136   : > { %v411_v63 = vrot.slane %v388_v48, 3  ;;  %v610_v1 = vsel %vm542_vm8, %v609_v59, %v608_v61  ;;  %v1027_v3 = vsel %vm975_vm3, %v388_v48, -inf  ;;  %v412_v5 = vrot.slane %v388_v48, 4  ;;  %v384_v12 = vpop.f32.mrf.mxu2 }
 0x137   : > { %v612_v4 = vsel %vm545_vm9, %v611_v62, %v610_v1  ;;  %v1032_v6 = vsel %vm975_vm3, %v409_v56, -inf  ;;  %v1036_v7 = vsel %vm975_vm3, %v410_v57, -inf  ;;  %v413_v9 = vrot.slane %v388_v48, 5 }
 0x138   : > { %v662_v8 = vsel %vm661_vm10, %v612_v4, -inf  ;;  %v1040_v10 = vsel %vm975_vm3, %v415_v60, -inf  ;;  %v1044_v13 = vsel %vm975_vm3, %v411_v63, -inf  ;;  %v615_v15 = vrot.slane %v1027_v3, 7 }
 0x139   : > { %663 = vmax.xlane.f32.xlu2 %v662_v8  ;;  %v617_v16 = vrot.slane %v1032_v6, 6  ;;  %v619_v17 = vrot.slane %v1036_v7, 5  ;;  %v1052_v18 = vsel %vm975_vm3, %v412_v5, -inf  ;;  %v614_v19 = vsel %vm527_vm11, %v1040_v10, %v613_v14 }
 0x13a   : > { %v414_v20 = vrot.slane %v388_v48, 6  ;;  %v416_v21 = vrot.slane %v1018_v0, 1  ;;  %v385_v22 = vadd.f32 %v384_v12, %v349_v11  ;;  %v1059_v23 = vsel %vm975_vm3, %v413_v9, -inf }
 0x13b   : > { %v616_v24 = vsel %vm530_vm4, %v615_v15, %v614_v19  ;;  %v621_v25 = vrot.slane %v1044_v13, 4  ;;  %v417_v27 = vrot.slane %v1018_v0, 2  ;;  %v418_v29 = vrot.slane %v1018_v0, 3 }
 0x13c   : > { %v618_v26 = vsel %vm533_vm5, %v617_v16, %v616_v24  ;;  %v422_v30 = vrot.slane %v1018_v0, 7  ;;  %v623_v32 = vrot.slane %v1052_v18, 3  ;;  %v419_v33 = vrot.slane %v1018_v0, 4 }
 0x13d   : > { %v620_v31 = vsel %vm536_vm6, %v619_v17, %v618_v26  ;;  %v1072_v37 = vsel %vm975_vm3, %v414_v20, -inf  ;;  %v625_v39 = vrot.slane %v1059_v23, 2  ;;  %v420_v40 = vrot.slane %v1018_v0, 5 }
 0x13e   : > { %v622_v38 = vsel %vm539_vm7, %v621_v25, %v620_v31  ;;  %v1080_v41 = vsel %vm975_vm3, %v1018_v0, -inf  ;;  %v390_v42 = vmax.f32 %v385_v22, 0.0  ;;  %v1085_v46 = vsel %vm975_vm3, %v416_v21, -inf }
 0x13f   : > { %v624_v45 = vsel %vm542_vm8, %v623_v32, %v622_v38  ;;  %v1089_v47 = vsel %vm975_vm3, %v422_v30, -inf  ;;  %v1094_v50 = vsel %vm975_vm3, %v417_v27, -inf  ;;  %v1098_v52 = vsel %vm975_vm3, %v418_v29, -inf }
 0x140   : > { %v626_v48 = vsel %vm545_vm9, %v625_v39, %v624_v45  ;;  %v627_v53 = vrot.slane %v1072_v37, 1  ;;  %v1103_v54 = vsel %vm975_vm3, %v419_v33, -inf  ;;  %v629_v55 = vrot.slane %v1080_v41, 7 }
 0x141   : > { %665 = vmax.xlane.f32.xlu2 %v626_v48  ;;  %v631_v56 = vrot.slane %v1085_v46, 6  ;;  %v633_v57 = vrot.slane %v1094_v50, 5  ;;  %v1110_v58 = vsel %vm975_vm3, %v420_v40, -inf  ;;  %v635_v60 = vrot.slane %v1098_v52, 4 }
 0x142   : > { %v628_v59 = vsel %vm527_vm11, %v1089_v47, %v627_v53  ;;  %v421_v61 = vrot.slane %v1018_v0, 6  ;;  %v637_v63 = vrot.slane %v1103_v54, 3  ;;  %v423_v1 = vrot.slane %v390_v42, 1 }
 0x143   : > { %v630_v62 = vsel %vm530_vm4, %v629_v55, %v628_v59  ;;  %v424_v4 = vrot.slane %v390_v42, 2  ;;  %v639_v8 = vrot.slane %v1110_v58, 2  ;;  %v429_v9 = vrot.slane %v390_v42, 7 }
 0x144   : > { %v632_v5 = vsel %vm533_vm5, %v631_v56, %v630_v62  ;;  %v529_v11 = vrot.slane %v989_v36, 6  ;;  %v425_v14 = vrot.slane %v390_v42, 3  ;;  %v1125_v0 = vsel %vm975_vm3, %v421_v61, -inf }
 0x145   : > { %v634_v12 = vsel %vm536_vm6, %v633_v57, %v632_v5  ;;  %v1129_v16 = vsel %vm975_vm3, %v390_v42, -inf  ;;  %v1133_v17 = vsel %vm975_vm3, %v423_v1, -inf  ;;  %v526_v19 = vrot.slane %v985_v35, 7 }
 0x146   : > { %v636_v15 = vsel %vm539_vm7, %v635_v60, %v634_v12  ;;  %v426_v20 = vrot.slane %v390_v42, 4  ;;  %v1139_v21 = vsel %vm975_vm3, %v424_v4, -inf  ;;  %v532_v22 = vrot.slane %v997_v44, 5 }
 0x147   : > { %v638_v36 = vsel %vm542_vm8, %v637_v63, %v636_v15  ;;  %v427_v25 = vrot.slane %v390_v42, 5  ;;  %v1145_v26 = vsel %vm975_vm3, %v429_v9, -inf  ;;  %v1149_v35 = vsel %vm975_vm3, %v425_v14, -inf }
 0x148   : > { %v640_v24 = vsel %vm545_vm9, %v639_v8, %v638_v36  ;;  %v641_v27 = vrot.slane %v1125_v0, 1  ;;  %v643_v29 = vrot.slane %v1129_v16, 7  ;;  %v645_v30 = vrot.slane %v1133_v17, 6 }
 0x149   : > { %667 = vmax.xlane.f32.xlu0 %v640_v24  ;;  %v535_v44 = vrot.slane %v1004_v49, 4  ;;  %v547_v31 = vrot.slane %v1032_v6, 7  ;;  %v549_v32 = vrot.slane %v1036_v7, 6  ;;  %v647_v33 = vrot.slane %v1139_v21, 5 }
 0x14a   : > { %v1160_v38 = vsel %vm975_vm3, %v426_v20, -inf  ;;  %v642_v39 = vsel %vm527_vm11, %v1145_v26, %v641_v27  ;;  %v428_v40 = vrot.slane %v390_v42, 6  ;;  %v528_v45 = vsel %vm527_vm11, %v526_v19, %v981_v34 }
 0x14b   : > { %v1168_v49 = vsel %vm975_vm3, %v427_v25, -inf  ;;  %v644_v6 = vsel %vm530_vm4, %v643_v29, %v642_v39  ;;  %v649_v7 = vrot.slane %v1149_v35, 4  ;;  %v531_v48 = vsel %vm530_vm4, %v529_v11, %v528_v45 }
 0x14c   : > { %v646_v53 = vsel %vm533_vm5, %v645_v30, %v644_v6  ;;  %v492_v55 = vsel %vm975_vm3, %v428_v40, -inf  ;;  %v534_v42 = vsel %vm533_vm5, %v532_v22, %v531_v48  ;;  %v651_v56 = vrot.slane %v1160_v38, 3 }
 0x14d   : > { %v648_v34 = vsel %vm536_vm6, %v647_v33, %v646_v53  ;;  %v655_v57 = vrot.slane %v492_v55, 1  ;;  %v548_v59 = vsel %vm527_vm11, %v547_v31, %v1027_v3  ;;  %v653_v61 = vrot.slane %v1168_v49, 2 }
 0x14e   : > { %v650_v60 = vsel %vm539_vm7, %v649_v7, %v648_v34  ;;  %v537_v62 = vsel %vm536_vm6, %v535_v44, %v534_v42  ;;  %v550_v5 = vsel %vm530_vm4, %v549_v32, %v548_v59  ;;  %v551_v8 = vrot.slane %v1044_v13, 5 }
 0x14f   : > { %v652_v63 = vsel %vm542_vm8, %v651_v56, %v650_v60  ;;  %v672_v1 = vsel %vm671_vm12, %v655_v57, -inf  ;;  %v561_v3 = vrot.slane %v1085_v46, 7  ;;  %v540_v9 = vsel %vm539_vm7, %v538_v28, %v537_v62 }
 0x150   : > { %v654_v4 = vsel %vm545_vm9, %v653_v61, %v652_v63  ;;  %673 = vmax.xlane.f32.xlu2 %v672_v1  ;;  %v541_v11 = vrot.slane %v1023_v2, 2  ;;  %v552_v12 = vsel %vm533_vm5, %v551_v8, %v550_v5  ;;  %v553_v51 = vrot.slane %v1052_v18, 4 }
 0x151   : > { %669 = vmax.xlane.f32.xlu1 %v654_v4  ;;  %v563_v14 = vrot.slane %v1094_v50, 6  ;;  %v544_v19 = vrot.slane %v993_v43, 1  ;;  %v562_v13 = vsel %vm527_vm11, %v561_v3, %v1080_v41  ;;  %v555_v36 = vrot.slane %v1059_v23, 3 }
 0x152   : > { %v543_v15 = vsel %vm542_vm8, %v541_v11, %v540_v9  ;;  %v554_v46 = vsel %vm536_vm6, %v553_v51, %v552_v12  ;;  %v565_v20 = vrot.slane %v1098_v52, 5  ;;  %v575_v50 = vrot.slane %v1133_v17, 7 }
 0x153   : > { %v546_v2 = vsel %vm545_vm9, %v544_v19, %v543_v15  ;;  %v564_v18 = vsel %vm530_vm4, %v563_v14, %v562_v13  ;;  %v556_v22 = vsel %vm539_vm7, %v555_v36, %v554_v46  ;;  %v567_v43 = vrot.slane %v1103_v54, 4 }
 0x154   : > { %v557_v24 = vrot.slane %v1072_v37, 2  ;;  %v566_v41 = vsel %vm533_vm5, %v565_v20, %v564_v18  ;;  %v577_v25 = vrot.slane %v1139_v21, 6  ;;  %v569_v52 = vrot.slane %v1110_v58, 3 }
 0x155   : > { %v559_v27 = vrot.slane %v1040_v10, 1  ;;  %v576_v29 = vsel %vm527_vm11, %v575_v50, %v1129_v16  ;;  %v568_v17 = vsel %vm536_vm6, %v567_v43, %v566_v41  ;;  %v571_v37 = vrot.slane %v1125_v0, 2 }
 0x156   : > { %v558_v23 = vsel %vm542_vm8, %v557_v24, %v556_v22  ;;  %v578_v54 = vsel %vm530_vm4, %v577_v25, %v576_v29  ;;  %v579_v21 = vrot.slane %v1149_v35, 5  ;;  %v570_v44 = vsel %vm539_vm7, %v569_v52, %v568_v17 }
 0x157   : > { %v560_v30 = vsel %vm545_vm9, %v559_v27, %v558_v23  ;;  %v573_v58 = vrot.slane %v1089_v47, 1  ;;  %v581_v31 = vrot.slane %v1160_v38, 4  ;;  %v572_v16 = vsel %vm542_vm8, %v571_v37, %v570_v44 }
 0x158   : > { %593 = vmax.xlane.f32.xlu2 %v546_v2  ;;  %v580_v10 = vsel %vm533_vm5, %v579_v21, %v578_v54  ;;  %v583_v33 = vrot.slane %v1168_v49, 3  ;;  %v585_v35 = vrot.slane %v492_v55, 2  ;;  %v587_v47 = vrot.slane %v1145_v26, 1 }
 0x159   : > { %v582_v32 = vsel %vm536_vm6, %v581_v31, %v580_v10  ;;  %v574_v0 = vsel %vm545_vm9, %v573_v58, %v572_v16  ;;  %v887_v38 = vmov -inf  }
 0x15a   : > { %v584_v39 = vsel %vm539_vm7, %v583_v33, %v582_v32  ;;  %268 = vst.msk [vmem:[#allocation2] sm:$0xff] %vm267_vm13, %v887_v38 }
 0x15b   : > { %v586_v40 = vsel %vm542_vm8, %v585_v35, %v584_v39  ;;  %269 = vst.msk [vmem:[#allocation2 + $0x8] sm:$0xff] %vm267_vm13, %v887_v38 }
 0x15c   : > { %v588_v45 = vsel %vm545_vm9, %v587_v47, %v586_v40  ;;  %270 = vst.msk [vmem:[#allocation2 + $0x10] sm:$0xff] %vm267_vm13, %v887_v38 }
 0x15d   : > { %271 = vst.msk [vmem:[#allocation2 + $0x18] sm:$0xff] %vm267_vm13, %v887_v38 }
 0x160   : > { %595 = vmax.xlane.f32.xlu2 %v560_v30 }
 0x161   : > { %v699_v53 = vld [vmem:[#allocation2] sm:$0xff] }
 0x162   : > { %v700_v60 = vld [vmem:[#allocation2 + $0x8] sm:$0xff] }
 0x163   : > { %v701_v8 = vld [vmem:[#allocation2 + $0x10] sm:$0xff] }
 0x164   : > { %v702_v15 = vld [vmem:[#allocation2 + $0x18] sm:$0xff] }
 0x168   : > { %597 = vmax.xlane.f32.xlu2 %v574_v0 }
 0x170   : > { %599 = vmax.xlane.f32.xlu2 %v588_v45 }
 0x1ac   : > { %v664_v49 = vpop.xlane.xlu2 %663 }
 0x1ad   : > { %v681_v26 = vrot.slane %v664_v49, 1 }
 0x1b4   : > { %v666_v6 = vpop.xlane.xlu2 %665 }
 0x1b5   : > { %v682_v48 = vrot.slane %v666_v6, 1 }
 0x1b7   : > { %v683_v55 = vsel %vm680_vm14, %v681_v26, %v682_v48 }
 0x1bc   : > { %v668_v34 = vpop.xlane.xlu0 %667 }
 0x1bd   : > { %v684_v59 = vrot.slane %v668_v34, 1 }
 0x1bf   : > { %v685_v61 = vsel %vm680_vm14, %v682_v48, %v684_v59 }
 0x1c3   : > { %v674_v7 = vpop.xlane.xlu2 %673 }
 0x1c4   : > { %v670_v28 = vpop.xlane.xlu1 %669  ;;  %v688_v51 = vrot.slane %v674_v7, 1 }
 0x1c5   : > { %v686_v5 = vrot.slane %v670_v28, 1 }
 0x1c7   : > { %v687_v3 = vsel %vm680_vm14, %v684_v59, %v686_v5  ;;  %v689_v19 = vsel %vm680_vm14, %v686_v5, %v688_v51 }
 0x1cb   : > { %v594_v42 = vpop.xlane.xlu2 %593 }
 0x1cc   : > { %v695_v56 = vsel %vm694_vm15, %v594_v42, %v683_v55 }
 0x1cd   : > { %v703_v57 = vmax.f32 %v699_v53, %v695_v56 }
 0x1cf   : > { %708 = vst.msk [vmem:[#allocation2] sm:$0xff] %vm267_vm13, %v703_v57 }
 0x1d3   : > { %v596_v62 = vpop.xlane.xlu2 %595 }
 0x1d4   : > { %v696_v63 = vsel %vm694_vm15, %v596_v62, %v685_v61 }
 0x1d5   : > { %v704_v1 = vmax.f32 %v700_v60, %v696_v63 }
 0x1d6   : > { %v715_v4 = vld [vmem:[#allocation2] sm:$0xff] }
 0x1d7   : > { %719 = vst.msk [vmem:[%s261_s29] sm:$0xff] %vm267_vm13, %v715_v4 }
 0x1d8   : > { %709 = vst.msk [vmem:[#allocation2 + $0x8] sm:$0xff] %vm267_vm13, %v704_v1 }
 0x1db   : > { %v598_v9 = vpop.xlane.xlu2 %597 }
 0x1dc   : > { %v697_v11 = vsel %vm694_vm15, %v598_v9, %v687_v3 }
 0x1dd   : > { %v705_v12 = vmax.f32 %v701_v8, %v697_v11 }
 0x1df   : > { %v716_v14 = vld [vmem:[#allocation2 + $0x8] sm:$0xff]  ;;  %710 = vst.msk [vmem:[#allocation2 + $0x10] sm:$0xff] %vm267_vm13, %v705_v12 }
 0x1e0   : > { %720 = vst.msk [vmem:[%s261_s29 + $0x8] sm:$0xff] %vm267_vm13, %v716_v14 }
 0x1e3   : > { %v600_v13 = vpop.xlane.xlu2 %599 }
 0x1e4   : > { %v698_v46 = vsel %vm694_vm15, %v600_v13, %v689_v19 }
 0x1e5   : > { %v706_v36 = vmax.f32 %v702_v15, %v698_v46 }
 0x1e6   : > { %v717_v20 = vld [vmem:[#allocation2 + $0x10] sm:$0xff] }
 0x1e7   : > { %721 = vst.msk [vmem:[%s261_s29 + $0x10] sm:$0xff] %vm267_vm13, %v717_v20 }
 0x1e8   : > { %711 = vst.msk [vmem:[#allocation2 + $0x18] sm:$0xff] %vm267_vm13, %v706_v36 }
 0x1ef   : > { %v718_v2 = vld [vmem:[#allocation2 + $0x18] sm:$0xff] }
 0x1f0   : > { %722 = vst.msk [vmem:[%s261_s29 + $0x18] sm:$0xff] %vm267_vm13, %v718_v2 }
 0x1f1 PF: > { %s15_s20 = sadd.s32 1, %s884_s20   ;;  %s1273_s18 = smov %s880_s19 }
 0x1f2   : > { %p12_p5 = scmp.ge.s32.totalorder %s15_s20, 4   ;;  %s1274_s19 = smov %s1276_s21 }
 0x1f4   :  { %14 = sbr.rel (!%p12_p5) target bundleno = 2 (0x2), region = 81 }

</bundles_post_ra>
